<compile_context>
chip_gen: v6e
topology: v6e:2x2x1
jax: 0.10.0
libtpu: 0.0.40
codegen_flags: <defaults>
</compile_context>

<pallas_src>
import numpy as np
import jax
import jax.numpy as jnp
from jax import lax
from jax.experimental import pallas as pl
from jax.experimental.pallas import tpu as pltpu

BN_EPS = 1e-5
LEAKY_SLOPE = 0.01  # nn.LeakyReLU() default


# -----------------------------------------------------------------------------
# pltpu.roll direction calibration: one tiny probe kernel, cached. Its inputs are
# concrete, so it dispatches eagerly even if first reached under an outer trace;
# __main__ additionally calls it explicitly before any jit (review concern).
# -----------------------------------------------------------------------------
_ROLL_SIGN_CACHE = []


def _roll_probe_kernel(x_ref, o_ref):
    o_ref[...] = pltpu.roll(x_ref[...], shift=1, axis=1)


def _pltpu_roll_sign():
    """Returns s such that pltpu.roll(x, (s*k) % L, axis) == jnp.roll(x, k, axis)."""
    if not _ROLL_SIGN_CACHE:
        x = jnp.arange(8 * 128, dtype=jnp.float32).reshape(8, 128)
        y = pl.pallas_call(
            _roll_probe_kernel,
            out_shape=jax.ShapeDtypeStruct((8, 128), jnp.float32),
        )(x)
        _ROLL_SIGN_CACHE.append(
            1 if bool(jnp.array_equal(y, jnp.roll(x, 1, axis=1))) else -1)
    return _ROLL_SIGN_CACHE[0]


# -----------------------------------------------------------------------------
# Host-side precompute: border masks for the 9 taps of the padded 3x3 conv.
# mask[t, p] == 1 iff tap t's source pixel for destination pixel p lies inside
# the same image (i.e. it encodes the conv zero-padding).            [review #1]
# -----------------------------------------------------------------------------
def make_border_masks(N, H, W, dtype=jnp.bfloat16):
    masks = np.zeros((9, N * H * W), np.float32)
    for ky in range(3):
        for kx in range(3):
            m = np.ones((H, W), np.float32)
            if ky == 0:
                m[0, :] = 0.0
            if ky == 2:
                m[H - 1, :] = 0.0
            if kx == 0:
                m[:, 0] = 0.0
            if kx == 2:
                m[:, W - 1] = 0.0
            masks[ky * 3 + kx] = np.tile(m.reshape(-1), N)
    # TODO(synk): on v5e (no bf16 VALU) keep the masks / mask-multiply in f32.
    return jnp.asarray(masks, dtype=dtype)


# -----------------------------------------------------------------------------
# Fused kernel: all `repeat` blocks in ONE un-gridded pallas_call.
# In-kernel layout is channel-major: channels on sublanes, N*H*W pixels on lanes
# (lane-dense: NHW is a multiple of 128 -> unmasked dense stores).
# -----------------------------------------------------------------------------
def _make_fused_kernel(N, H, W, C, R):
    Cb = C // 2
    NHW = N * H * W
    inv_nhw = 1.0 / float(NHW)
    roll_sign = _pltpu_roll_sign()

    # Static lane shift per tap: destination pixel p reads source pixel p + off.
    offs = [(ky - 1) * W + (kx - 1) for ky in range(3) for kx in range(3)]
    shifts = [(roll_sign * (-off)) % NHW for off in offs]

    def kernel(x_ref, mask_ref, w1_ref, g1_ref, be1_ref, w2_ref, g2_ref, be2_ref, o_ref):
        # Hoisted loop-invariant values (kernel body runs exactly once: no grid).
        ones_col = jnp.ones((NHW, 1), jnp.float32)            # BN reductions on the MXU
        masks = mask_ref[...]                                  # (9, NHW) bf16, VMEM resident
        mask_rows = [masks[t:t + 1, :] for t in range(9)]      # (1, NHW) each (hoisted)

        def bn_leaky(v, gamma, beta):
            # Training-mode BN (biased variance), one-pass stats; lane reductions run on the
            # otherwise-idle MXU instead of the XLU (f32 operands, f32 accumulate). [review #6]
            # TODO(synk): at production NHW switch to two-pass / shifted variance (one-pass
            # E[x^2]-E[x]^2 can cancel catastrophically).
            s = jnp.dot(v, ones_col, preferred_element_type=jnp.float32)       # (ch, 1)
            sq = jnp.dot(v * v, ones_col, preferred_element_type=jnp.float32)  # (ch, 1)
            mu = s * inv_nhw
            var = sq * inv_nhw - mu * mu
            scale = gamma * lax.rsqrt(var + BN_EPS)
            shift = beta - mu * scale
            v = v * scale + shift
            return jnp.where(v > 0, v, LEAKY_SLOPE * v)

        def block(r, a):
            # --- Conv2d(C, Cb, 1): one MXU matmul, bf16 operands, f32 accumulation.
            # Conv bias omitted: exactly cancelled by the training-mode BN mean subtraction.
            h = jnp.dot(w1_ref[r], a.astype(jnp.bfloat16),
                        preferred_element_type=jnp.float32)                    # (Cb, NHW)
            h = bn_leaky(h, g1_ref[r], be1_ref[r])
            hb = h.astype(jnp.bfloat16)     # build taps in bf16                 [review #2]

            # --- Conv2d(Cb, C, 3, pad=1): 9 accumulating matmuls over lane-rolled (XLU),
            # border-masked taps — no im2col intermediate, no concatenate.   [review #1, #3]
            acc = None
            for t in range(9):
                if offs[t] == 0:
                    tap = hb                               # centre tap: no roll, no mask
                else:
                    tap = pltpu.roll(hb, shift=shifts[t], axis=1) * mask_rows[t]
                contrib = jnp.dot(w2_ref[r * 9 + t], tap,
                                  preferred_element_type=jnp.float32)          # (C, NHW)
                acc = contrib if acc is None else acc + contrib
            return bn_leaky(acc, g2_ref[r], be2_ref[r])

        # Repeat blocks as an in-kernel loop: no per-grid-step overhead, weights resident,
        # activation carry never round-trips through HBM.                   [review #7, #8]
        a = lax.fori_loop(0, R, block, x_ref[...], unroll=True)
        o_ref[...] = a                       # single lane-dense (C, NHW) f32 store

    return kernel


def pack_params(params_list, C):
    """Host-side packing (done once): weights pre-transposed to the channel-major layouts the
    kernel consumes and pre-cast to bf16 (MXU operands); BN affine params stay f32.
    Conv biases (b1, b2) are intentionally NOT packed: a per-channel constant added before a
    training-mode BatchNorm is removed exactly by its mean subtraction."""
    Cb = C // 2
    R = len(params_list)
    w1 = jnp.stack([p[0].T for p in params_list]).astype(jnp.bfloat16)            # (R, Cb, C)
    g1 = jnp.stack([p[2].reshape(Cb, 1) for p in params_list])                    # (R, Cb, 1)
    be1 = jnp.stack([p[3].reshape(Cb, 1) for p in params_list])                   # (R, Cb, 1)
    # conv2 weight: per repeat (9, Cb, C) -> per-tap transposed (9, C, Cb), flattened to
    # (R*9, C, Cb) so the kernel indexes it with a single leading-axis index r*9 + t.
    w2 = jnp.stack([jnp.transpose(p[4], (0, 2, 1)) for p in params_list])         # (R, 9, C, Cb)
    w2 = w2.reshape(R * 9, C, Cb).astype(jnp.bfloat16)
    g2 = jnp.stack([p[6].reshape(C, 1) for p in params_list])                     # (R, C, 1)
    be2 = jnp.stack([p[7].reshape(C, 1) for p in params_list])                    # (R, C, 1)
    return w1, g1, be1, w2, g2, be2


def bottleneck_forward(x_nchw, packed, masks):
    """Public wrapper: NCHW in / NCHW out (matches the PyTorch module); transposes are glue."""
    w1, g1, be1, w2, g2, be2 = packed
    R = g1.shape[0]
    N, C, H, W = x_nchw.shape
    NHW = N * H * W

    # NCHW -> channel-major (C, N*H*W): pixels land on the lane axis (lane-dense).
    x_cm = jnp.transpose(x_nchw, (1, 0, 2, 3)).reshape(C, NHW)

    vmem = pl.BlockSpec(memory_space=pltpu.MemorySpace.VMEM)
    y_cm = pl.pallas_call(
        _make_fused_kernel(N, H, W, C, R),
        out_shape=jax.ShapeDtypeStruct((C, NHW), jnp.float32),
        # No grid: activation, masks and all R weight sets (~100 KB at this size) live in
        # VMEM for the single invocation; the repeat loop runs in-kernel.
        # TODO(synk): production shapes — re-introduce a grid tiling NHW (two-phase BN) plus
        # a repeat axis, add a "parallel" axis / bf16 carry for v7x (64 MiB VMEM, 2 TCs).
        in_specs=[vmem] * 8,
        out_specs=vmem,
        compiler_params=pltpu.CompilerParams(
            # Explicit limit (v5e scoped default is only 16 MiB); far above what this toy
            # size needs and within every generation's physical VMEM.
            vmem_limit_bytes=32 * 1024 * 1024,
        ),
    )(x_cm, masks, w1, g1, be1, w2, g2, be2)

    return jnp.transpose(y_cm.reshape(C, N, H, W), (1, 0, 2, 3))


def init_params(key, C, repeat):
    """Deterministic synthetic parameters (torch layouts re-laid out):
    conv1 weight stored as (C_in, C_out); conv2 weight as (ky*3+kx, C_in, C_out)."""
    Cb = C // 2
    params = []
    for i in range(repeat):
        ks = jax.random.split(jax.random.fold_in(key, i), 8)
        w1 = jax.random.normal(ks[0], (C, Cb), jnp.float32) / jnp.sqrt(float(C))
        b1 = 0.1 * jax.random.normal(ks[1], (1, Cb), jnp.float32)
        g1 = 1.0 + 0.1 * jax.random.normal(ks[2], (1, Cb), jnp.float32)
        be1 = 0.1 * jax.random.normal(ks[3], (1, Cb), jnp.float32)
        w2 = jax.random.normal(ks[4], (9, Cb, C), jnp.float32) / jnp.sqrt(9.0 * Cb)
        b2 = 0.1 * jax.random.normal(ks[5], (1, C), jnp.float32)
        g2 = 1.0 + 0.1 * jax.random.normal(ks[6], (1, C), jnp.float32)
        be2 = 0.1 * jax.random.normal(ks[7], (1, C), jnp.float32)
        params.append((w1, b1, g1, be1, w2, b2, g2, be2))
    return params


def _reference_forward(x_nchw, params_list):
    """Pure-JAX f32 reference (XLA convs, biases included) for the correctness check."""
    x = jnp.transpose(x_nchw, (0, 2, 3, 1))
    for (w1, b1, g1, be1, w2, b2, g2, be2) in params_list:
        h = lax.conv_general_dilated(
            x, w1.reshape(1, 1, *w1.shape), (1, 1), 'VALID',
            dimension_numbers=('NHWC', 'HWIO', 'NHWC')) + b1.reshape(1, 1, 1, -1)
        mu = jnp.mean(h, axis=(0, 1, 2), keepdims=True)
        var = jnp.mean((h - mu) ** 2, axis=(0, 1, 2), keepdims=True)
        h = (h - mu) * lax.rsqrt(var + BN_EPS) * g1.reshape(1, 1, 1, -1) + be1.reshape(1, 1, 1, -1)
        h = jnp.where(h > 0, h, LEAKY_SLOPE * h)
        w2h = w2.reshape(3, 3, w2.shape[1], w2.shape[2])
        y = lax.conv_general_dilated(
            h, w2h, (1, 1), 'SAME',
            dimension_numbers=('NHWC', 'HWIO', 'NHWC')) + b2.reshape(1, 1, 1, -1)
        mu2 = jnp.mean(y, axis=(0, 1, 2), keepdims=True)
        var2 = jnp.mean((y - mu2) ** 2, axis=(0, 1, 2), keepdims=True)
        y = (y - mu2) * lax.rsqrt(var2 + BN_EPS) * g2.reshape(1, 1, 1, -1) + be2.reshape(1, 1, 1, -1)
        x = jnp.where(y > 0, y, LEAKY_SLOPE * y)
    return jnp.transpose(x, (0, 3, 1, 2))


if __name__ == "__main__":
    key = jax.random.PRNGKey(0)
    N, C, H, W = 2, 8, 16, 16   # C must be even (bottle_c = C // 2); N*H*W multiple of 128
    repeat = 2

    k_x, k_p = jax.random.split(key)
    x = jax.random.normal(k_x, (N, C, H, W), jnp.float32)   # NCHW like the PyTorch module
    params = init_params(k_p, C, repeat)
    packed = pack_params(params, C)
    masks = make_border_masks(N, H, W)

    _pltpu_roll_sign()   # calibrate pltpu.roll convention once, eagerly (before any jit)

    fwd = jax.jit(lambda inp: bottleneck_forward(inp, packed, masks))
    out = jax.block_until_ready(fwd(x))

    assert out.shape == (N, C, H, W)
    assert bool(jnp.all(jnp.isfinite(out)))
    ref = _reference_forward(x, params)
    # bf16 MXU operands (f32 accumulation) -> slightly looser tolerance than pure f32; still
    # validates the layout / roll+mask / accumulating-matmul / fused in-kernel loop logic.
    np.testing.assert_allclose(np.asarray(out), np.asarray(ref), rtol=2e-2, atol=2e-2)

    print("KERNEL_OK")
</pallas_src>

<mosaic_0001>
module attributes {stable_mosaic.version = 11 : i64} {
  func.func @_roll_probe_kernel(%arg0: memref<8x128xf32, #tpu.memory_space<vmem>>, %arg1: memref<8x128xf32, #tpu.memory_space<vmem>>) attributes {dimension_semantics = [], scalar_prefetch = 0 : i64, scratch_operands = 0 : i64, tpu.core_type = #tpu.core_type<tc>} {
    %c0 = arith.constant 0 : index
    %c0_0 = arith.constant 0 : index
    %0 = vector.load %arg0[%c0, %c0_0] : memref<8x128xf32, #tpu.memory_space<vmem>>, vector<8x128xf32>
    %c1_i32 = arith.constant 1 : i32
    %1 = tpu.dynamic_rotate %0 by %c1_i32 dim 1 : vector<8x128xf32>, i32 -> vector<8x128xf32>
    %c0_1 = arith.constant 0 : index
    %c0_2 = arith.constant 0 : index
    %2 = vector.load %arg1[%c0_1, %c0_2] : memref<8x128xf32, #tpu.memory_space<vmem>>, vector<8x128xf32>
    tpu.vector_store %arg1[%c0_1, %c0_2], %1 {strides = array<i32>} : memref<8x128xf32, #tpu.memory_space<vmem>>, vector<8x128xf32>,
    return
  }
}

</mosaic_0001>

<bundles_post_ra>
// kernel: tpu_custom_call.1
= control target key start
LH: loop header
LB: loop body
LE: loop exit
PB: predicated region body
PF: predicated region fallthrough
CT: control target
= control target key end

     0   :  { %6 = vsyncpa [#allocation3], 0  ;;  %s106_s0 = inlined_call_operand.hbm [shape: f32[8,128], index: 0, kind: input, shape index: {}]   ;;  %s107_s1 = inlined_call_operand.hbm [shape: f32[8,128], index: 1, kind: output, shape index: {}]  }
   0x1   :  { %7 = vsyncpa [#allocation4], 0  ;;  %s87_s6 = smov [#allocation2]  }
   0x2   :  { %s14_s7 = sshll.u32 %s87_s6, 4  ;;  %s15_s7 = int_to_ptr.vmem [resolvable:$true] %s14_s7 }
   0x3   :  { %s51_s8 = scalar_lea.vmem %s15_s7, 128  ;;  %p56_p1 = scmp.lt.s32.totalorder %s15_s7, %s15_s7 }
   0x4   :  { %p52_p0 = scmp.ne.s32.totalorder %s15_s7, %s51_s8  ;;  %p57_p2 = scmp.lt.s32.totalorder %s51_s8, %s51_s8 }
   0x6   :  { %p58_p3 = por %p57_p2, %p56_p1 }
   0x8   :  { %p59_p4 = pnand %p58_p3, %p52_p0 }
   0xa   :  { %62 = shalt.err (!%p59_p4)
}
   0xb   :  { %17 = dma.hbm_to_vmem [thread:$0]  %s106_s0, 128, %s15_s7, [#allocation3]  }
   0xc   :  { %83 = dma.done.wait [#allocation3], 128  }
   0xd   :  { %84 = vsyncadd [#allocation3], 4294967168  ;;  %v21_v0 = vld [vmem:[#allocation2] sm:$0xff]  ;;  %s88_s11 = smov 1   ;;  %s89_s12 = smov [#allocation5]  }
   0xe   :  { %22 = vrot.lane.b32.xlu0 %v21_v0, %s88_s11  ;;  %s31_s13 = sshll.u32 %s89_s12, 4  ;;  %s32_s13 = int_to_ptr.vmem [resolvable:$true] %s31_s13 }
   0xf   :  { %s63_s14 = scalar_lea.vmem %s32_s13, 128  ;;  %p68_p6 = scmp.lt.s32.totalorder %s32_s13, %s32_s13 }
  0x10   :  { %p64_p5 = scmp.ne.s32.totalorder %s32_s13, %s63_s14  ;;  %p69_p7 = scmp.lt.s32.totalorder %s63_s14, %s63_s14 }
  0x12   :  { %p70_p8 = por %p69_p7, %p68_p6 }
  0x14   :  { %p71_p9 = pnand %p70_p8, %p64_p5 }
  0x80   :  { %v23_v1 = vpop.permute.xlu0 %22 }
  0x81   :  { %24 = vst [vmem:[#allocation5] sm:$0xff] %v23_v1 }
  0x82   :  { %74 = shalt.err (!%p71_p9)
}
  0x83   :  { %34 = dma.vmem_to_hbm [thread:$0]  %s32_s13, 128, %s107_s1, [#allocation4]  }
  0x84   :  { %85 = dma.done.wait [#allocation4], 128  }
  0x85   :  { %86 = vsyncadd [#allocation4], 4294967168 }
  0x86   :  { %38 = vsyncpa [#allocation3], 1 }
  0x87   :  { %39 = vsyncpa [#allocation4], 1 }

</bundles_post_ra>
